<compile_context>
chip_gen: v5e
topology: v5e:2x2
jax: 0.10.0
libtpu: 0.0.40
codegen_flags: <defaults>
</compile_context>

<pallas_src>
import jax
import jax.numpy as jnp
import numpy as np
from jax.experimental import pallas as pl
from jax.experimental.pallas import tpu as pltpu

# ----- "param" constants (small, consistent with the module's __init__) -----
BS      = 2     # param.bs   (batch)
W       = 8     # param.W    (memory word size)
R       = 2     # param.R    (number of read heads)
V_T     = 32    # param.v_t  (controller / output width)
N_MEM   = 16    # memory locations
IN_SIZE = 16    # Interface input width
CTR_IN  = 16    # controller input width

# ----- packed-slab layout constants -----
LHS_COLS   = CTR_IN + IN_SIZE + 1            # 33  ([ctrinput | x | 1])
LHS_PAD    = 40                              # padded to an 8-multiple contraction dim
GATE_COLS  = 3 * V_T                         # 96  (i, g, o) — forget gate dropped (c0 == 0)
IFACE_COLS = R * N_MEM                       # 32
WBIG_COLS  = GATE_COLS + IFACE_COLS          # 128 (lane-dense)
WBIG_ROWS  = LHS_COLS                        # 33
WBIG_PAD   = LHS_PAD                         # 40 (8-aligned)
PROJ_ROW   = WBIG_PAD                        # 40 : precomputed mem @ W_r blocks live here
SLAB_ROWS  = PROJ_ROW + R * N_MEM            # 72


def dnc_kernel(lhs_ref, slab_ref, out_ref):
    # ---- one fused front-end matmul (8-aligned 0:40 contraction):
    #      [ctrinput | x | 1 | 0s] @ blockdiag(w_ih', w_if; biases folded) -> (BS, 128) ----
    front = jnp.dot(lhs_ref[...], slab_ref[0:WBIG_PAD, :],
                    preferred_element_type=jnp.float32)            # (BS, 128)

    # ---- controller: single-step LSTM cell, h0 = c0 = 0 (forget gate is dead) ----
    i_g = jax.nn.sigmoid(front[:, 0:V_T])
    g_g = jnp.tanh(front[:, V_T:2 * V_T])
    o_g = jax.nn.sigmoid(front[:, 2 * V_T:3 * V_T])
    ctrl_out = o_g * jnp.tanh(i_g * g_g)                           # (BS, V_T)

    # ---- interface logits -> per-head softmax read weights ----
    # One row-max + one exp over the full (BS, 32) tile: subtracting a per-row constant
    # leaves each head's softmax unchanged, so only the per-head sums differ.
    iface = front[:, GATE_COLS:GATE_COLS + IFACE_COLS]             # (BS, R*N_MEM)
    iface = iface - jnp.max(iface, axis=-1, keepdims=True)
    p = jnp.exp(iface)                                             # (BS, 32)
    p0 = p[:, 0:N_MEM]
    p1 = p[:, N_MEM:2 * N_MEM]
    inv0 = pl.reciprocal(jnp.sum(p0, axis=-1, keepdims=True), approx=True)
    inv1 = pl.reciprocal(jnp.sum(p1, axis=-1, keepdims=True), approx=True)

    # ---- read: per-head  softmax_weights @ (mem @ W_r[head])  with proj precomputed ----
    proj0 = slab_ref[PROJ_ROW:PROJ_ROW + N_MEM, 0:V_T]             # (N_MEM, V_T)
    proj1 = slab_ref[PROJ_ROW + N_MEM:PROJ_ROW + 2 * N_MEM, 0:V_T] # (N_MEM, V_T)
    bbb = (jnp.dot(p0 * inv0, proj0, preferred_element_type=jnp.float32)
           + jnp.dot(p1 * inv1, proj1, preferred_element_type=jnp.float32))

    out_ref[...] = ctrl_out + bbb


def prepare_params(params):
    """Pack all six parameter tensors into one lane-dense (72, 128) fp32 slab.

    Call ONCE when parameters change; the result is reused by every forward call.
    Also precomputes the input-independent read projection mem @ W_r per head.
    """
    (w_ih, b_ih, w_if, b_if, mem, w_r) = params
    # drop the dead forget-gate columns (gate order i, f, g, o; c0 == 0)
    w_ih_r = jnp.concatenate([w_ih[:, 0:V_T], w_ih[:, 2 * V_T:4 * V_T]], axis=1)
    b_ih_r = jnp.concatenate([b_ih[:, 0:V_T], b_ih[:, 2 * V_T:4 * V_T]], axis=1)
    # block-diagonal fused weight; biases folded in as a row matched by the 1-column of LHS
    top  = jnp.concatenate([w_ih_r, jnp.zeros((CTR_IN, IFACE_COLS), jnp.float32)], axis=1)
    midd = jnp.concatenate([jnp.zeros((IN_SIZE, GATE_COLS), jnp.float32), w_if], axis=1)
    bias = jnp.concatenate([b_ih_r, b_if], axis=1)
    w_big = jnp.concatenate([top, midd, bias], axis=0)                     # (33, 128)
    w_big = jnp.pad(w_big, ((0, WBIG_PAD - WBIG_ROWS), (0, 0)))            # (40, 128)
    # precomputed read projection: proj[r*N_MEM:(r+1)*N_MEM, :] = mem @ W_r[r*W:(r+1)*W, :]
    proj = jnp.concatenate(
        [mem @ w_r[r * W:(r + 1) * W, :] for r in range(R)], axis=0)       # (R*N_MEM, V_T)
    proj_p = jnp.pad(proj, ((0, 0), (0, WBIG_COLS - V_T)))                 # (32, 128)
    slab = jnp.concatenate([w_big, proj_p], axis=0)                        # (72, 128)
    return jax.device_put(slab.astype(jnp.float32))


@jax.jit
def isadditiontheproblem_forward(x, ctrinput, slab):
    # single concatenate per call: [ctrinput | x | 1 | zero-pad] -> (BS, 40)
    lhs = jnp.concatenate(
        [ctrinput, x,
         jnp.ones((BS, 1), jnp.float32),
         jnp.zeros((BS, LHS_PAD - LHS_COLS), jnp.float32)], axis=1)
    vmem = pl.BlockSpec(memory_space=pltpu.MemorySpace.VMEM)
    return pl.pallas_call(
        dnc_kernel,
        out_shape=jax.ShapeDtypeStruct((BS, V_T), jnp.float32),
        in_specs=[vmem, vmem],
        out_specs=vmem,
    )(lhs, slab)


def reference_forward(x, ctrinput, params):
    """Pure-JAX reference with the full (un-fused, 4-gate) math, for sanity checking."""
    (w_ih, b_ih, w_if, b_if, mem, w_r) = params
    gates = ctrinput @ w_ih + b_ih
    i_g = jax.nn.sigmoid(gates[:, 0 * V_T:1 * V_T])
    f_g = jax.nn.sigmoid(gates[:, 1 * V_T:2 * V_T])          # multiplies c0 == 0
    g_g = jnp.tanh(gates[:, 2 * V_T:3 * V_T])
    o_g = jax.nn.sigmoid(gates[:, 3 * V_T:4 * V_T])
    c_t = f_g * 0.0 + i_g * g_g
    ctrl_out = o_g * jnp.tanh(c_t)

    iface = x @ w_if + b_if
    read_w = jax.nn.softmax(iface.reshape(BS, R, N_MEM), axis=-1)
    read_vec = jnp.einsum("brn,nw->brw", read_w, mem).reshape(BS, R * W)
    return ctrl_out + read_vec @ w_r


def make_params():
    key = jax.random.PRNGKey(0)
    k1, k2, k3, k4, k5, k6 = jax.random.split(key, 6)
    w_ih = jax.random.normal(k1, (CTR_IN, 4 * V_T), jnp.float32) * 0.1
    b_ih = jax.random.normal(k2, (1, 4 * V_T), jnp.float32) * 0.1
    w_if = jax.random.normal(k3, (IN_SIZE, R * N_MEM), jnp.float32) * 0.1
    b_if = jax.random.normal(k4, (1, R * N_MEM), jnp.float32) * 0.1
    mem = jax.random.normal(k5, (N_MEM, W), jnp.float32) * 0.1
    # NOTE: the PyTorch module zero-initializes W_r; a random W_r is used here so the
    # softmax -> memory-read -> W_r path is numerically exercised.
    w_r = jax.random.normal(k6, (R * W, V_T), jnp.float32) * 0.1
    return (w_ih, b_ih, w_if, b_if, mem, w_r)


if __name__ == "__main__":
    key = jax.random.PRNGKey(0)
    kx, kc = jax.random.split(key)
    x = jax.random.normal(kx, (BS, IN_SIZE), jnp.float32)          # Interface input
    ctrinput = jax.random.normal(kc, (BS, CTR_IN), jnp.float32)    # controller input
    params = make_params()

    # One-time parameter packing (hoisted off the per-call path).
    slab = prepare_params(params)

    out = isadditiontheproblem_forward(x, ctrinput, slab)
    out = jax.block_until_ready(out)

    ref = reference_forward(x, ctrinput, params)
    assert out.shape == (BS, V_T)
    assert np.allclose(np.asarray(out), np.asarray(ref), atol=2e-3, rtol=2e-3)
    print("KERNEL_OK")
</pallas_src>

<mosaic_0001>
module attributes {stable_mosaic.version = 11 : i64} {
  func.func @dnc_kernel(%arg0: memref<2x40xf32, #tpu.memory_space<vmem>>, %arg1: memref<72x128xf32, #tpu.memory_space<vmem>>, %arg2: memref<2x32xf32, #tpu.memory_space<vmem>>) attributes {dimension_semantics = [], scalar_prefetch = 0 : i64, scratch_operands = 0 : i64, tpu.core_type = #tpu.core_type<tc>} {
    %c0 = arith.constant 0 : index
    %c0_0 = arith.constant 0 : index
    %0 = vector.load %arg0[%c0, %c0_0] : memref<2x40xf32, #tpu.memory_space<vmem>>, vector<2x40xf32>
    %c0_1 = arith.constant 0 : index
    %c0_2 = arith.constant 0 : index
    %1 = vector.load %arg1[%c0_1, %c0_2] : memref<72x128xf32, #tpu.memory_space<vmem>>, vector<40x128xf32>
    %cst = arith.constant dense<0.000000e+00> : vector<2x128xf32>
    %2 = tpu.matmul %0, %1, %cst {dimension_numbers = #tpu.dot_dimension_numbers<[1], [0], [0], [1], [0, 0, 1, 1], [], []>} : vector<2x40xf32>, vector<40x128xf32>, vector<2x128xf32> -> vector<2x128xf32>
    %3 = vector.extract_strided_slice %2 {offsets = [0, 0], sizes = [2, 32], strides = [1, 1]} : vector<2x128xf32> to vector<2x32xf32>
    %4 = arith.negf %3 : vector<2x32xf32>
    %5 = math.exp %4 : vector<2x32xf32>
    %cst_3 = arith.constant 1.000000e+00 : f32
    %6 = vector.broadcast %cst_3 : f32 to vector<2x32xf32>
    %7 = arith.addf %6, %5 : vector<2x32xf32>
    %8 = arith.divf %6, %7 : vector<2x32xf32>
    %9 = vector.extract_strided_slice %2 {offsets = [0, 32], sizes = [2, 32], strides = [1, 1]} : vector<2x128xf32> to vector<2x32xf32>
    %10 = math.tanh %9 : vector<2x32xf32>
    %11 = vector.extract_strided_slice %2 {offsets = [0, 64], sizes = [2, 32], strides = [1, 1]} : vector<2x128xf32> to vector<2x32xf32>
    %12 = arith.negf %11 : vector<2x32xf32>
    %13 = math.exp %12 : vector<2x32xf32>
    %cst_4 = arith.constant 1.000000e+00 : f32
    %14 = vector.broadcast %cst_4 : f32 to vector<2x32xf32>
    %15 = arith.addf %14, %13 : vector<2x32xf32>
    %16 = arith.divf %14, %15 : vector<2x32xf32>
    %17 = arith.mulf %8, %10 : vector<2x32xf32>
    %18 = math.tanh %17 : vector<2x32xf32>
    %19 = arith.mulf %16, %18 : vector<2x32xf32>
    %20 = vector.extract_strided_slice %2 {offsets = [0, 96], sizes = [2, 32], strides = [1, 1]} : vector<2x128xf32> to vector<2x32xf32>
    %cst_5 = arith.constant dense<0xFF800000> : vector<2xf32>
    %21 = vector.multi_reduction <maximumf>, %20, %cst_5 [1] : vector<2x32xf32> to vector<2xf32>
    %22 = vector.shape_cast %21 : vector<2xf32> to vector<2x1xf32>
    %23 = vector.broadcast %22 : vector<2x1xf32> to vector<2x32xf32>
    %24 = arith.subf %20, %23 : vector<2x32xf32>
    %25 = math.exp %24 : vector<2x32xf32>
    %26 = vector.extract_strided_slice %25 {offsets = [0, 0], sizes = [2, 16], strides = [1, 1]} : vector<2x32xf32> to vector<2x16xf32>
    %27 = vector.extract_strided_slice %25 {offsets = [0, 16], sizes = [2, 16], strides = [1, 1]} : vector<2x32xf32> to vector<2x16xf32>
    %cst_6 = arith.constant dense<0.000000e+00> : vector<2xf32>
    %28 = vector.multi_reduction <add>, %26, %cst_6 [1] : vector<2x16xf32> to vector<2xf32>
    %29 = vector.shape_cast %28 : vector<2xf32> to vector<2x1xf32>
    %30 = tpu.reciprocal %29 {approx = true} : vector<2x1xf32> -> vector<2x1xf32>
    %cst_7 = arith.constant dense<0.000000e+00> : vector<2xf32>
    %31 = vector.multi_reduction <add>, %27, %cst_7 [1] : vector<2x16xf32> to vector<2xf32>
    %32 = vector.shape_cast %31 : vector<2xf32> to vector<2x1xf32>
    %33 = tpu.reciprocal %32 {approx = true} : vector<2x1xf32> -> vector<2x1xf32>
    %c40 = arith.constant 40 : index
    %c0_8 = arith.constant 0 : index
    %34 = vector.load %arg1[%c40, %c0_8] : memref<72x128xf32, #tpu.memory_space<vmem>>, vector<16x32xf32>
    %c56 = arith.constant 56 : index
    %c0_9 = arith.constant 0 : index
    %35 = vector.load %arg1[%c56, %c0_9] : memref<72x128xf32, #tpu.memory_space<vmem>>, vector<16x32xf32>
    %36 = vector.broadcast %30 : vector<2x1xf32> to vector<2x16xf32>
    %37 = arith.mulf %26, %36 : vector<2x16xf32>
    %cst_10 = arith.constant dense<0.000000e+00> : vector<2x32xf32>
    %38 = tpu.matmul %37, %34, %cst_10 {dimension_numbers = #tpu.dot_dimension_numbers<[1], [0], [0], [1], [0, 0, 1, 1], [], []>} : vector<2x16xf32>, vector<16x32xf32>, vector<2x32xf32> -> vector<2x32xf32>
    %39 = vector.broadcast %33 : vector<2x1xf32> to vector<2x16xf32>
    %40 = arith.mulf %27, %39 : vector<2x16xf32>
    %cst_11 = arith.constant dense<0.000000e+00> : vector<2x32xf32>
    %41 = tpu.matmul %40, %35, %cst_11 {dimension_numbers = #tpu.dot_dimension_numbers<[1], [0], [0], [1], [0, 0, 1, 1], [], []>} : vector<2x16xf32>, vector<16x32xf32>, vector<2x32xf32> -> vector<2x32xf32>
    %42 = arith.addf %38, %41 : vector<2x32xf32>
    %43 = arith.addf %19, %42 : vector<2x32xf32>
    %c0_12 = arith.constant 0 : index
    %c0_13 = arith.constant 0 : index
    %44 = vector.load %arg2[%c0_12, %c0_13] : memref<2x32xf32, #tpu.memory_space<vmem>>, vector<2x32xf32>
    tpu.vector_store %arg2[%c0_12, %c0_13], %43 {strides = array<i32>} : memref<2x32xf32, #tpu.memory_space<vmem>>, vector<2x32xf32>,
    return
  }
}

</mosaic_0001>

<bundles_post_ra>
// kernel: isadditiontheproblem_forward.1
= control target key start
LH: loop header
LB: loop body
LE: loop exit
PB: predicated region body
PF: predicated region fallthrough
CT: control target
= control target key end

     0   :  { %7 = vsyncpa [#allocation3], 0  ;;  %s309_s0 = inlined_call_operand.vmem [shape: f32[2,40], index: 0, kind: input, shape index: {}]   ;;  %s310_s1 = inlined_call_operand.hbm [shape: f32[72,128], index: 1, kind: input, shape index: {}]   ;;  %s311_s2 = inlined_call_operand.hbm [shape: f32[2,32], index: 2, kind: output, shape index: {}]  }
   0x1   :  { %8 = vsyncpa [#allocation4], 0  ;;  %s15_s11 = sshll.u32 %s310_s1, 4  ;;  %s275_s12 = smov [#allocation2]   ;;  %s16_s11 = int_to_ptr.hbm [resolvable:$true] %s15_s11 }
   0x2   :  { %s17_s13 = sshll.u32 %s275_s12, 4  ;;  %s276_s14 = smov 128   ;;  %s18_s13 = int_to_ptr.vmem [resolvable:$true] %s17_s13 }
   0x3   :  { %s277_s15 = smov 8  }
   0x4   :  { %23 = dma.hbm_to_vmem [thread:$0]  %s16_s11, 1152, %s18_s13, [#allocation3], %s276_s14, %s276_s14, %s277_s15  }
   0x5   :  { %271 = dma.done.wait [#allocation3], 1152  }
   0x6   :  { %272 = vsyncadd [#allocation3], 4294966144  ;;  %v33_v0 = vld [vmem:[#allocation2 + $0x20] sm:$0xff]  ;;  %v32_v1 = vld [vmem:[#allocation2 + $0x18] sm:$0xff]  ;;  %vm34_vm0 = vcmask 326656   ;;  %vm89_vm1 = vcmask 1042176  }
   0x7   :  { %49 = vmatpush.msra.mxu0 %v33_v0  ;;  %v31_v2 = vld [vmem:[#allocation2 + $0x10] sm:$0xff]  ;;  %v30_v3 = vld [vmem:[#allocation2 + $0x8] sm:$0xff]  ;;  %v29_v4 = vld [vmem:[#allocation2] sm:$0xff]  ;;  %s278_s17 = smov 16   ;;  %s279_s18 = smov 32   ;;  %vm100_vm2 = vcmask 123904  }
   0x8   :  { %v28_v5 = vld [vmem:[%s309_s0] sm:$0x3]  ;;  %v113_v16 = vld [vmem:[#allocation2 + $0x30] sm:$0xff]  ;;  %v112_v17 = vld [vmem:[#allocation2 + $0x28] sm:$0xff]  ;;  %s280_s0 = smov 96   ;;  %vm121_vm3 = vcmask 130048  }
   0x9   :  { %50 = vmatpush.msra.mxu0 %v32_v1  ;;  %163 = vmatpush.msra.mxu2 %v113_v16  ;;  %v115_v29 = vld [vmem:[#allocation2 + $0x40] sm:$0xff]  ;;  %v114_v30 = vld [vmem:[#allocation2 + $0x38] sm:$0xff]  ;;  %s281_s19 = smov 64   ;;  %s282_s20 = smov [#allocation5]   ;;  %vm178_vm8 = vcmask 254976  }
   0xa   :  { %138 = vmatpush.msra.mxu1 %v115_v29  ;;  %s185_s21 = sshll.u32 %s282_s20, 4  ;;  %s187_s24 = sshll.u32 %s311_s2, 4  ;;  %s186_s21 = int_to_ptr.vmem [resolvable:$true] %s185_s21  ;;  %s188_s24 = int_to_ptr.hbm [resolvable:$true] %s187_s24 }
   0xb   :  { %51 = vmatpush.msra.mxu0 %v31_v2  ;;  %164 = vmatpush.msra.mxu2 %v112_v17 }
   0xc   :  { %139 = vmatpush.msra.mxu1 %v114_v30 }
   0xd   :  { %52 = vmatpush.msra.mxu0 %v30_v3 }
   0xf   :  { %53 = vmatpush.msra.mxu0 %v29_v4 }
  0x10   :  { %197 = vmatmul.msk.f32.vlgmr.msra.gmra.mxu0 %vm34_vm0, %v28_v5 }
  0x8d   :  { %v55_v6 = vpop.f32.mrf.mxu0 }
  0x8e   :  { %v90_v7 = vsel %vm89_vm1, %v55_v6, -inf  ;;  %v198_v25 = vmul.f32 -1.442695, %v55_v6 }
  0x8f   :  { %91 = vmax.xlane.f32.xlu0 %v90_v7 }
 0x102   :  { %v92_v8 = vpop.xlane.xlu0 %91 }
 0x103   :  { %v93_v9 = vsub.f32 %v55_v6, %v92_v8 }
 0x105   :  { %v94_v10 = vmul.f32 1.442695, %v93_v9 }
 0x107   :  { %209 = vpow2.f32 %v94_v10 }
 0x10d   :  { %v210_v11 = vpop.eup %209 }
 0x10e   :  { %105 = vrot.lane.b32.xlu1 %v210_v11, %s278_s17  ;;  %97 = vrot.lane.b32.xlu0 %v210_v11, %s279_s18 }
 0x180   :  { %v106_v12 = vpop.permute.xlu1 %105  ;;  %v98_v13 = vpop.permute.xlu0 %97 }
 0x181   :  { %v108_v14 = vsel %vm100_vm2, %v106_v12, 0.0  ;;  %v101_v15 = vsel %vm100_vm2, %v98_v13, 0.0 }
 0x182   :  { %109 = vadd.xlane.f32.xlu2 %v108_v14  ;;  %102 = vadd.xlane.f32.xlu1 %v101_v15 }
 0x1f5   :  { %v110_v18 = vpop.xlane.xlu2 %109  ;;  %v103_v19 = vpop.xlane.xlu1 %102 }
 0x1f6   :  { %211 = vrcp.f32 %v110_v18 }
 0x1f7   :  { %213 = vrcp.f32 %v103_v19 }
 0x1f8   :  { %215 = vtanh.f32 %v55_v6 }
 0x1f9   :  { %217 = vpow2.f32 %v198_v25 }
 0x1fc   :  { %v212_v20 = vpop.eup %211 }
 0x1fd   :  { %v214_v21 = vpop.eup %213  ;;  %v117_v22 = vmul.f32 %v212_v20, %v210_v11 }
 0x1fe   :  { %v116_v23 = vmul.f32 %v214_v21, %v210_v11  ;;  %v216_v24 = vpop.eup %215 }
 0x1ff   :  { %119 = vrot.lane.b32.xlu0 %v117_v22, %s278_s17  ;;  %v218_v26 = vpop.eup %217 }
 0x200   :  { %145 = vrot.lane.b32.xlu2 %v116_v23, %s279_s18  ;;  %v61_v27 = vadd.f32 1.0, %v218_v26 }
 0x202   :  { %219 = vrcp.f32 %v61_v27  ;;  %v73_v36 = vand.u32 2147483648, %v61_v27  ;;  %vm67_vm5 = vweird.f32 %v61_v27  ;;  %v71_v37 = vand.u32 2147483647, %v61_v27 }
 0x204   :  { %v74_v39 = vor.u32 1.1754944e-38, %v73_v36  ;;  %vm72_vm7 = vcmp.eq.f32.partialorder %v71_v37, 8.507059e+37 }
 0x208   :  { %79 = vrot.lane.b32.xlu2 %v216_v24, %s280_s0  ;;  %v220_v28 = vpop.eup %219 }
 0x209   :  { %v63_v31 = vmul.f32 %v220_v28, %v61_v27  ;;  %vm68_vm4 = vweird.f32 %v220_v28 }
 0x20a   :  { %vm69_vm6 = vmor %vm67_vm5, %vm68_vm4 }
 0x20b   :  { %v64_v32 = vsub.f32 1.0, %v63_v31 }
 0x20d   :  { %v65_v33 = vmul.f32 %v220_v28, %v64_v32 }
 0x20f   :  { %v66_v35 = vadd.f32 %v220_v28, %v65_v33 }
 0x211   :  { %v70_v38 = vsel %vm69_vm6, %v220_v28, %v66_v35 }
 0x212   :  { %v75_v41 = vsel %vm72_vm7, %v74_v39, %v70_v38 }
 0x25a   :  { %v146_v34 = vpop.permute.xlu2 %145 }
 0x25b   :  { %200 = vmatmul.msk.f32.vlgmr.msra.gmra.mxu2 %vm121_vm3, %v146_v34 }
 0x262   :  { %v80_v40 = vpop.permute.xlu2 %79 }
 0x263   :  { %v82_v42 = vmul.f32 %v80_v40, %v75_v41 }
 0x265   :  { %221 = vtanh.f32 %v82_v42 }
 0x26b   :  { %v222_v43 = vpop.eup %221 }
 0x26c   :  { %85 = vrot.lane.b32.xlu0 %v222_v43, %s281_s19 }
 0x271   :  { %v120_v44 = vpop.permute.xlu0 %119 }
 0x272   :  { %199 = vmatmul.msk.f32.vlgmr.msra.gmra.mxu1 %vm121_vm3, %v120_v44 }
 0x2de   :  { %v166_v45 = vpop.f32.mrf.mxu2  ;;  %v86_v48 = vpop.permute.xlu0 %85 }
 0x2df   :  { %v88_v49 = vmul.f32 %v86_v48, %v75_v41 }
 0x2ef   :  { %v141_v46 = vpop.f32.mrf.mxu1 }
 0x2f0   :  { %v167_v47 = vadd.f32 %v166_v45, %v141_v46 }
 0x2f2   :  { %170 = vrot.lane.b32.xlu2 %v167_v47, %s281_s19 }
 0x34c   :  { %v171_v50 = vpop.permute.xlu2 %170 }
 0x34d   :  { %v173_v51 = vadd.f32 %v171_v50, %v88_v49 }
 0x34f   :  { %175 = vrot.lane.b32.xlu0 %v173_v51, %s281_s19 }
 0x3c1   :  { %v176_v52 = vpop.permute.xlu0 %175 }
 0x3c2   :  { %179 = vst.msk [vmem:[#allocation5] sm:$0x3] %vm178_vm8, %v176_v52 }
 0x3c3   :  { %190 = dma.vmem_to_hbm [thread:$0]  %s186_s21, 32, %s188_s24, [#allocation4]  }
 0x3c4   :  { %273 = dma.done.wait [#allocation4], 32  }
 0x3c5   :  { %274 = vsyncadd [#allocation4], 4294967264 }
 0x3c6   :  { %195 = vsyncpa [#allocation3], 1 }
 0x3c7   :  { %196 = vsyncpa [#allocation4], 1 }

</bundles_post_ra>
